<compile_context>
chip_gen: v7x
topology: tpu7x:2x2x1
jax: 0.10.0
libtpu: 0.0.40
codegen_flags: <defaults>
</compile_context>

<pallas_src>
import math
import functools

import jax
import jax.numpy as jnp
from jax.experimental import pallas as pl
from jax.experimental.pallas import tpu as pltpu

_INV_SQRT2 = 0.7071067811865476  # plain Python float literal (no captured consts)


def _make_matmul_gelu_kernel(TC, CT):
    """One (row-tile, Cout-tile) grid step: single MXU dot + bias + exact GELU."""

    def kernel(x_ref, w_ref, b_ref, o_ref):
        # x_ref: (TM, Kc_pad)        bf16 im2col rows for this row tile
        # w_ref: (Kc_pad, Cout_pad)  full weight slab (resident in VMEM)
        # b_ref: (1, Cout_pad)       full bias row   (resident in VMEM)
        # o_ref: (TM, TC)            lane-dense output tile
        if CT == 1:
            w = w_ref[...]
            b = b_ref[...]
        else:
            col = pl.multiple_of(pl.program_id(1) * TC, 128)
            w = w_ref[:, pl.ds(col, TC)]
            b = b_ref[:, pl.ds(col, TC)]
        acc = jnp.dot(x_ref[...], w, preferred_element_type=jnp.float32)
        y = acc + b.astype(jnp.float32)
        # exact (erf-based) GELU, matching torch.nn.GELU() default
        y = 0.5 * y * (1.0 + jax.lax.erf(y * _INV_SQRT2))
        o_ref[...] = y.astype(o_ref.dtype)

    return kernel


def _round_up(x, m):
    return ((x + m - 1) // m) * m


@functools.partial(jax.jit, static_argnames=("stride",))
def basic_conv(x_nchw, weight_oihw, bias, *, stride=1):
    """BasicConv forward: GELU(Conv2d(x, W, b, stride, padding=K//2))."""
    N, Cin, H, W = x_nchw.shape
    Cout, Cin_w, K, K2 = weight_oihw.shape
    assert Cin == Cin_w and K == K2
    pad = K // 2
    Hout = (H + 2 * pad - K) // stride + 1
    Wout = (W + 2 * pad - K) // stride + 1

    LANE = 128
    mxu_dtype = jnp.bfloat16  # bf16 operands, f32 accumulation in the MXU

    # ---- wrapper-side im2col (layout plumbing only) -------------------------
    # NCHW interface kept to match the PyTorch module; if the surrounding model
    # runs NHWC these two transposes disappear.
    x_nhwc = jnp.transpose(x_nchw, (0, 2, 3, 1)).astype(mxu_dtype)
    x_pad = jnp.pad(x_nhwc, ((0, 0), (pad, pad), (pad, pad), (0, 0)))

    cols = []
    for kh in range(K):
        for kw in range(K):
            cols.append(jax.lax.slice(
                x_pad,
                (0, kh, kw, 0),
                (N, kh + (Hout - 1) * stride + 1,
                 kw + (Wout - 1) * stride + 1, Cin),
                (1, stride, stride, 1)))
    patches = jnp.concatenate(cols, axis=-1)        # (N, Hout, Wout, K*K*Cin)

    Kc = K * K * Cin
    Kc_pad = _round_up(Kc, LANE)                    # lane-dense contraction dim
    Cout_pad = _round_up(Cout, LANE)                # lane-dense output channels

    M = N * Hout * Wout

    # ---- row-tile sizing (target ~512 matmul rows, VMEM-aware) --------------
    TM = 512
    vmem_budget = 40 * 1024 * 1024                  # leaves headroom on v7x (64 MiB)
    w_bytes = Kc_pad * Cout_pad * 2 + Cout_pad * 4  # resident weights + bias
    while TM > 8:
        need = 2 * TM * Kc_pad * 2 + 2 * TM * LANE * 4 + w_bytes
        if need <= vmem_budget:
            break
        TM //= 2
    if M <= TM:                                     # split small problems so both
        TM = max(8, _round_up(-(-M // 2), 8))       # v7x TensorCores get a tile
    MT = pl.cdiv(M, TM)
    M_pad = MT * TM

    patches = patches.reshape(M, Kc)
    patches = jnp.pad(patches, ((0, M_pad - M), (0, Kc_pad - Kc)))

    # Cout tile: 256 when it divides evenly (fills the 2x256 MXU on v6e/v7x),
    # otherwise 128 (native v5e shape).
    TC = 256 if (Cout_pad % 256 == 0) else 128
    CT = Cout_pad // TC

    # ---- weights / bias ------------------------------------------------------
    w_mat = jnp.transpose(weight_oihw, (2, 3, 1, 0)).reshape(Kc, Cout)
    w_mat = jnp.pad(w_mat, ((0, Kc_pad - Kc), (0, Cout_pad - Cout))).astype(mxu_dtype)
    b_row = jnp.pad(bias.astype(jnp.float32), (0, Cout_pad - Cout)).reshape(1, Cout_pad)

    kernel = _make_matmul_gelu_kernel(TC, CT)

    out_flat = pl.pallas_call(
        kernel,
        out_shape=jax.ShapeDtypeStruct((M_pad, Cout_pad), x_nchw.dtype),
        grid_spec=pltpu.PrefetchScalarGridSpec(
            num_scalar_prefetch=0,
            grid=(MT, CT),                      # Cout tile innermost: the x row tile
            in_specs=[                          # is not re-fetched across c steps
                pl.BlockSpec((TM, Kc_pad), lambda m, c: (m, 0)),
                pl.BlockSpec((Kc_pad, Cout_pad), lambda m, c: (0, 0)),  # resident
                pl.BlockSpec((1, Cout_pad), lambda m, c: (0, 0)),       # resident
            ],
            out_specs=pl.BlockSpec((TM, TC), lambda m, c: (m, c)),
        ),
        compiler_params=pltpu.CompilerParams(
            dimension_semantics=("parallel", "parallel"),
            vmem_limit_bytes=48 * 1024 * 1024),
    )(patches, w_mat, b_row)

    out = out_flat[:M, :Cout].reshape(N, Hout, Wout, Cout)
    return jnp.transpose(out, (0, 3, 1, 2))         # back to NCHW


def _reference(x_nchw, weight_oihw, bias, *, stride=1):
    K = weight_oihw.shape[-1]
    pad = K // 2
    y = jax.lax.conv_general_dilated(
        x_nchw, weight_oihw,
        window_strides=(stride, stride),
        padding=((pad, pad), (pad, pad)),
        dimension_numbers=("NCHW", "OIHW", "NCHW"),
        precision=jax.lax.Precision.HIGHEST)
    y = y + bias.reshape(1, -1, 1, 1)
    return jax.nn.gelu(y, approximate=False)


if __name__ == "__main__":
    N, Cin, H, W = 2, 4, 16, 16
    Cout, K, stride = 8, 3, 1

    key = jax.random.PRNGKey(0)
    kx, kw, kb = jax.random.split(key, 3)

    x = jax.random.normal(kx, (N, Cin, H, W), dtype=jnp.float32)
    # deterministic Conv2d-style init (kaiming-uniform-ish bounds)
    fan_in = Cin * K * K
    bound = 1.0 / math.sqrt(fan_in)
    weight = jax.random.uniform(kw, (Cout, Cin, K, K), jnp.float32,
                                minval=-bound, maxval=bound)
    bias = jax.random.uniform(kb, (Cout,), jnp.float32,
                              minval=-bound, maxval=bound)

    out = basic_conv(x, weight, bias, stride=stride)
    out = jax.block_until_ready(out)
    assert out.shape == (N, Cout, H // stride, W // stride), out.shape

    # Tight check against a reference whose operands go through the same bf16
    # quantisation as the kernel's MXU inputs (isolates kernel bugs from the
    # intended bf16-operand numerics recommended by the perf review).
    x_q = x.astype(jnp.bfloat16).astype(jnp.float32)
    w_q = weight.astype(jnp.bfloat16).astype(jnp.float32)
    ref_q = _reference(x_q, w_q, bias, stride=stride)
    assert jnp.allclose(out, ref_q, atol=1e-3, rtol=1e-3), float(
        jnp.max(jnp.abs(out - ref_q)))

    # Looser sanity check against the exact f32 module semantics; the only
    # difference is the deliberate bf16 operand cast.
    ref = _reference(x, weight, bias, stride=stride)
    assert jnp.allclose(out, ref, atol=5e-2, rtol=5e-2), float(
        jnp.max(jnp.abs(out - ref)))

    print("KERNEL_OK")
</pallas_src>

<mosaic_0001>
module attributes {stable_mosaic.version = 11 : i64} {
  func.func @kernel(%arg0: i32, %arg1: i32, %arg2: memref<256x128xbf16, #tpu.memory_space<vmem>>, %arg3: memref<128x128xbf16, #tpu.memory_space<vmem>>, %arg4: memref<1x128xf32, #tpu.memory_space<vmem>>, %arg5: memref<256x128xf32, #tpu.memory_space<vmem>>) attributes {dimension_semantics = [#tpu.dimension_semantics<parallel>, #tpu.dimension_semantics<parallel>], iteration_bounds = array<i64: 2, 1>, scalar_prefetch = 0 : i64, scratch_operands = 0 : i64, tpu.core_type = #tpu.core_type<tc>, window_params = [{transform_indices = @transform_0, window_bounds = array<i64: 256, 128>}, {pipeline_mode = #tpu.pipeline_mode<synchronous>, transform_indices = @transform_1, window_bounds = array<i64: 128, 128>}, {pipeline_mode = #tpu.pipeline_mode<synchronous>, transform_indices = @transform_2, window_bounds = array<i64: 1, 128>}, {transform_indices = @transform_3, window_bounds = array<i64: 256, 128>}]} {
    %c0 = arith.constant 0 : index
    %c0_0 = arith.constant 0 : index
    %0 = vector.load %arg3[%c0, %c0_0] : memref<128x128xbf16, #tpu.memory_space<vmem>>, vector<128x128xbf16>
    %c0_1 = arith.constant 0 : index
    %c0_2 = arith.constant 0 : index
    %1 = vector.load %arg4[%c0_1, %c0_2] : memref<1x128xf32, #tpu.memory_space<vmem>>, vector<1x128xf32>
    %c0_3 = arith.constant 0 : index
    %c0_4 = arith.constant 0 : index
    %2 = vector.load %arg2[%c0_3, %c0_4] : memref<256x128xbf16, #tpu.memory_space<vmem>>, vector<256x128xbf16>
    %cst = arith.constant dense<0.000000e+00> : vector<256x128xf32>
    %3 = tpu.matmul %2, %0, %cst {dimension_numbers = #tpu.dot_dimension_numbers<[1], [0], [0], [1], [0, 0, 1, 1], [], []>} : vector<256x128xbf16>, vector<128x128xbf16>, vector<256x128xf32> -> vector<256x128xf32>
    %4 = vector.broadcast %1 : vector<1x128xf32> to vector<256x128xf32>
    %5 = arith.addf %3, %4 : vector<256x128xf32>
    %cst_5 = arith.constant 5.000000e-01 : f32
    %6 = vector.broadcast %cst_5 : f32 to vector<256x128xf32>
    %7 = arith.mulf %6, %5 : vector<256x128xf32>
    %cst_6 = arith.constant 0.707106769 : f32
    %8 = vector.broadcast %cst_6 : f32 to vector<256x128xf32>
    %9 = arith.mulf %5, %8 : vector<256x128xf32>
    %10 = math.erf %9 : vector<256x128xf32>
    %cst_7 = arith.constant 1.000000e+00 : f32
    %11 = vector.broadcast %cst_7 : f32 to vector<256x128xf32>
    %12 = arith.addf %11, %10 : vector<256x128xf32>
    %13 = arith.mulf %7, %12 : vector<256x128xf32>
    %c0_8 = arith.constant 0 : index
    %c0_9 = arith.constant 0 : index
    %14 = vector.load %arg5[%c0_8, %c0_9] : memref<256x128xf32, #tpu.memory_space<vmem>>, vector<256x128xf32>
    tpu.vector_store %arg5[%c0_8, %c0_9], %13 {strides = array<i32>} : memref<256x128xf32, #tpu.memory_space<vmem>>, vector<256x128xf32>,
    return
  }
  func.func @transform_0(%arg0: i32, %arg1: i32) -> (i32, i32) {
    %c0_i32 = arith.constant 0 : i32
    %c0_i32_0 = arith.constant 0 : i32
    return %arg0, %c0_i32 : i32, i32
  }
  func.func @transform_1(%arg0: i32, %arg1: i32) -> (i32, i32) {
    %c0_i32 = arith.constant 0 : i32
    %c0_i32_0 = arith.constant 0 : i32
    %c0_i32_1 = arith.constant 0 : i32
    return %c0_i32, %c0_i32_0 : i32, i32
  }
  func.func @transform_2(%arg0: i32, %arg1: i32) -> (i32, i32) {
    %c0_i32 = arith.constant 0 : i32
    %c0_i32_0 = arith.constant 0 : i32
    %c0_i32_1 = arith.constant 0 : i32
    return %c0_i32, %c0_i32_0 : i32, i32
  }
  func.func @transform_3(%arg0: i32, %arg1: i32) -> (i32, i32) {
    %c0_i32 = arith.constant 0 : i32
    return %arg0, %arg1 : i32, i32
  }
}

</mosaic_0001>

<bundles_post_ra>
// kernel: basic_conv.1
= control target key start
LH: loop header
LB: loop body
LE: loop exit
PB: predicated region body
PF: predicated region fallthrough
CT: control target
= control target key end

     0   :  { %s1102_s12 = smov 0   ;;  %s1104_s13 = smov 0   ;;  %s1355_s0 = inlined_call_operand.vmem [shape: bf16[512,128], index: 0, kind: input, shape index: {}]   ;;  %s1356_s1 = inlined_call_operand.vmem [shape: bf16[128,128], index: 1, kind: input, shape index: {}]   ;;  %s1357_s2 = inlined_call_operand.vmem [shape: f32[1,128], index: 2, kind: input, shape index: {}]   ;;  %s1358_s3 = inlined_call_operand.vmem [shape: f32[512,128], index: 3, kind: output, shape index: {}]  }
   0x1   :  { %s1106_s14 = smov 0  }
   0x2 LB: > { %s25_s15 = sadd.s32 1, %s1076_s13  ;;  %p826_p0 = scmp.ge.s32.totalorder %s1080_s14, 1  ;;  %s1080_s14 = sphi %s1106_s14, %s13_s14   ;;  %s1076_s13 = sphi %s1104_s13, %s1360_s13   ;;  %s1072_s12 = sphi %s1102_s12, %s1359_s12  }
   0x3   : > { %p27_p1 = scmp.ge.s32.totalorder %s25_s15, 2  ;;  %p152_p2 = scmp.lt.s32.totalorder %s1080_s14, 3 }
   0x5   : > { %s1362_s15 = smov (%p27_p1, %s25_s15), 0  ;;  %p153_p3 = pnand %p826_p0, %p152_p2 }
   0x6   : > { %v970_v0 = vld [vmem:[%s1356_s1] sm:$0xff] (!%p153_p3)   ;;  %s827_s18 = sshll.u32 (!%p153_p3), %s1072_s12, 5  ;;  %v971_v1 = vld [vmem:[%s1356_s1 + $0x8] sm:$0xff] (!%p153_p3)   ;;  %v972_v2 = vld [vmem:[%s1356_s1 + $0x10] sm:$0xff] (!%p153_p3)  }
   0x7   : > { %156 = sbr.rel (%p153_p3) target bundleno = 311 (0x137), region = 32  ;;  %p180_p4 = scmp.lt.s32.totalorder (!%p153_p3), %s827_s18, 63  ;;  %882 = vmatprep.subr.bf16.mxu0 (!%p153_p3), %v970_v0  ;;  %930 = vmatprep.subr.bf16.mxu1 (!%p153_p3), %v970_v0  ;;  %v973_v3 = vld [vmem:[%s1356_s1 + $0x18] sm:$0xff] (!%p153_p3)   ;;  %v974_v6 = vld [vmem:[%s1356_s1 + $0x20] sm:$0xff] (!%p153_p3)   ;;  %v975_v7 = vld [vmem:[%s1356_s1 + $0x28] sm:$0xff] (!%p153_p3)  }
   0x8   : > { %883 = vmatpush3.bf16.msra.mxu0 (!%p153_p3), %v970_v0  ;;  %938 = vmatpush3.bf16.msra.mxu1 (!%p153_p3), %v970_v0  ;;  %v976_v8 = vld [vmem:[%s1356_s1 + $0x30] sm:$0xff] (!%p153_p3)   ;;  %v977_v9 = vld [vmem:[%s1356_s1 + $0x38] sm:$0xff] (!%p153_p3)   ;;  %v1171_v24 = vld [vmem:[%s1357_s2] ss:$0 sm:$0xff] (!%p153_p3) }
   0x9   : > { %884 = vmatprep.subr.bf16.mxu0 (!%p153_p3), %v971_v1  ;;  %931 = vmatprep.subr.bf16.mxu1 (!%p153_p3), %v971_v1 }
   0xc   : > { %885 = vmatpush3.bf16.msra.mxu0 (!%p153_p3), %v971_v1  ;;  %939 = vmatpush3.bf16.msra.mxu1 (!%p153_p3), %v971_v1 }
   0xd   : > { %886 = vmatprep.subr.bf16.mxu0 (!%p153_p3), %v972_v2  ;;  %932 = vmatprep.subr.bf16.mxu1 (!%p153_p3), %v972_v2 }
   0xe   : > { %s1364_s18 = smov (!%p180_p4, %s827_s18), 63 }
   0xf   : > { %s828_s23 = sshll.u32 %s1364_s18, 2  ;;  %s830_s12 = sshll.u32 %s1364_s18, 3 }
  0x10   : > { %s1135_s26 = scalar_lea.vmem %s1355_s0, %s828_s23  ;;  %887 = vmatpush3.bf16.msra.mxu0 %v972_v2  ;;  %940 = vmatpush3.bf16.msra.mxu1 %v972_v2  ;;  %s1211_s18 = scalar_lea.vmem %s1358_s3, %s830_s12 }
  0x11   : > { %v978_v4 = vld [vmem:[%s1135_s26] sm:$0xff]   ;;  %888 = vmatprep.subr.bf16.mxu0 %v973_v3  ;;  %933 = vmatprep.subr.bf16.mxu1 %v973_v3  ;;  %v980_v10 = vld [vmem:[%s1135_s26 + $0x8] sm:$0xff]   ;;  %v982_v12 = vld [vmem:[%s1135_s26 + $0x10] sm:$0xff]  }
  0x12   : > { %v979_v5 = vld [vmem:[%s1135_s26 + $0x40] sm:$0xff]   ;;  %898 = vmatprep.mubr.bf16.mxu0 %v978_v4  ;;  %v981_v11 = vld [vmem:[%s1135_s26 + $0x48] sm:$0xff]   ;;  %v983_v13 = vld [vmem:[%s1135_s26 + $0x50] sm:$0xff]  }
  0x13   : > { %914 = vmatprep.mubr.bf16.mxu1 %v979_v5  ;;  %v984_v14 = vld [vmem:[%s1135_s26 + $0x18] sm:$0xff]   ;;  %v986_v16 = vld [vmem:[%s1135_s26 + $0x20] sm:$0xff]   ;;  %v988_v18 = vld [vmem:[%s1135_s26 + $0x28] sm:$0xff]  }
  0x14   : > { %889 = vmatpush3.bf16.msra.mxu0 %v973_v3  ;;  %941 = vmatpush3.bf16.msra.mxu1 %v973_v3  ;;  %v985_v15 = vld [vmem:[%s1135_s26 + $0x58] sm:$0xff]   ;;  %v987_v17 = vld [vmem:[%s1135_s26 + $0x60] sm:$0xff]   ;;  %v989_v19 = vld [vmem:[%s1135_s26 + $0x68] sm:$0xff]  }
  0x15   : > { %890 = vmatprep.subr.bf16.mxu0 %v974_v6  ;;  %934 = vmatprep.subr.bf16.mxu1 %v974_v6  ;;  %v990_v20 = vld [vmem:[%s1135_s26 + $0x30] sm:$0xff]   ;;  %v992_v22 = vld [vmem:[%s1135_s26 + $0x38] sm:$0xff]  }
  0x16   : > { %v991_v21 = vld [vmem:[%s1135_s26 + $0x70] sm:$0xff]   ;;  %v993_v23 = vld [vmem:[%s1135_s26 + $0x78] sm:$0xff]  }
  0x18   : > { %891 = vmatpush3.bf16.msra.mxu0 %v974_v6  ;;  %942 = vmatpush3.bf16.msra.mxu1 %v974_v6 }
  0x19   : > { %892 = vmatprep.subr.bf16.mxu0 %v975_v7  ;;  %935 = vmatprep.subr.bf16.mxu1 %v975_v7 }
  0x1c   : > { %893 = vmatpush3.bf16.msra.mxu0 %v975_v7  ;;  %943 = vmatpush3.bf16.msra.mxu1 %v975_v7 }
  0x1d   : > { %894 = vmatprep.subr.bf16.mxu0 %v976_v8  ;;  %936 = vmatprep.subr.bf16.mxu1 %v976_v8 }
  0x20   : > { %895 = vmatpush3.bf16.msra.mxu0 %v976_v8  ;;  %944 = vmatpush3.bf16.msra.mxu1 %v976_v8 }
  0x21   : > { %896 = vmatprep.subr.bf16.mxu0 %v977_v9  ;;  %937 = vmatprep.subr.bf16.mxu1 %v977_v9 }
  0x24   : > { %897 = vmatpush3.bf16.msra.mxu0 %v977_v9  ;;  %945 = vmatpush3.bf16.msra.mxu1 %v977_v9 }
  0x27   : > { %899 = vmatmul.mubr.bf16.vlgmr.msra.gmra.mrb[0].mxu0 %v980_v10  ;;  %915 = vmatmul.mubr.bf16.vlgmr.msra.gmra.mrb[0].mxu1 %v981_v11 }
  0x28   : > { %902 = vmatprep.mubr.bf16.mxu0 %v982_v12  ;;  %918 = vmatprep.mubr.bf16.mxu1 %v983_v13 }
  0x2f   : > { %903 = vmatmul.mubr.bf16.gmra.mrb[4].mxu0 %v984_v14  ;;  %919 = vmatmul.mubr.bf16.gmra.mrb[4].mxu1 %v985_v15 }
  0x30   : > { %906 = vmatprep.mubr.bf16.mxu0 %v986_v16  ;;  %922 = vmatprep.mubr.bf16.mxu1 %v987_v17 }
  0x37   : > { %907 = vmatmul.mubr.bf16.gmra.mrb[8].mxu0 %v988_v18  ;;  %923 = vmatmul.mubr.bf16.gmra.mrb[8].mxu1 %v989_v19 }
  0x38   : > { %910 = vmatprep.mubr.bf16.mxu0 %v990_v20  ;;  %926 = vmatprep.mubr.bf16.mxu1 %v991_v21 }
  0x3f   : > { %911 = vmatmul.mubr.bf16.gmra.mrb[12].mxu0 %v992_v22  ;;  %927 = vmatmul.mubr.bf16.gmra.mrb[12].mxu1 %v993_v23 }
  0xfa   : > { %v900_v25 = vpop.f32.mrb[0].mxu0  ;;  %v916_v26 = vpop.f32.mrb[0].mxu1 }
  0xfb   : > { %v437_v27 = vadd.f32 %v900_v25, %v1171_v24  ;;  %v501_v28 = vadd.f32 %v916_v26, %v1171_v24  ;;  %v428_v29 = vpop.f32.mrb[1].mxu0  ;;  %v492_v30 = vpop.f32.mrb[1].mxu1 }
  0xfc   : > { %v429_v31 = vadd.f32 %v1171_v24, %v428_v29  ;;  %v493_v32 = vadd.f32 %v1171_v24, %v492_v30  ;;  %v901_v33 = vpop.f32.mrb[2].mxu0  ;;  %v917_v34 = vpop.f32.mrb[2].mxu1 }
  0xfd   : > { %v589_v35 = vmul.f32 0.70710677, %v437_v27  ;;  %v605_v36 = vmul.f32 0.70710677, %v501_v28  ;;  %v440_v39 = vadd.f32 %v901_v33, %v1171_v24  ;;  %v504_v40 = vadd.f32 %v917_v34, %v1171_v24  ;;  %v431_v41 = vpop.f32.mrb[3].mxu0  ;;  %v495_v42 = vpop.f32.mrb[3].mxu1 }
  0xfe   : > { %v587_v37 = vmul.f32 0.70710677, %v429_v31  ;;  %v603_v38 = vmul.f32 0.70710677, %v493_v32  ;;  %v432_v43 = vadd.f32 %v1171_v24, %v431_v41  ;;  %v496_v44 = vadd.f32 %v1171_v24, %v495_v42 }
  0xff   : > { %994 = verf.f32 %v589_v35  ;;  %v590_v45 = vmul.f32 0.70710677, %v440_v39  ;;  %v606_v46 = vmul.f32 0.70710677, %v504_v40  ;;  %v557_v61 = vmul.f32 0.5, %v437_v27 }
 0x100   : > { %996 = verf.f32 %v605_v36  ;;  %v588_v47 = vmul.f32 0.70710677, %v432_v43  ;;  %v604_v49 = vmul.f32 0.70710677, %v496_v44  ;;  %v573_v62 = vmul.f32 0.5, %v501_v28 }
 0x101   : > { %998 = verf.f32 %v587_v37  ;;  %v555_v1 = vmul.f32 0.5, %v429_v31  ;;  %v571_v8 = vmul.f32 0.5, %v493_v32  ;;  %v558_v9 = vmul.f32 0.5, %v440_v39 }
 0x102   : > { %1000 = verf.f32 %v603_v38  ;;  %v904_v48 = vpop.f32.mrb[4].mxu0  ;;  %v920_v51 = vpop.f32.mrb[4].mxu1  ;;  %v574_v10 = vmul.f32 0.5, %v504_v40  ;;  %v556_v19 = vmul.f32 0.5, %v432_v43  ;;  %v572_v20 = vmul.f32 0.5, %v496_v44 }
 0x103   : > { %1002 = verf.f32 %v590_v45  ;;  %v453_v50 = vadd.f32 %v904_v48, %v1171_v24  ;;  %v444_v52 = vpop.f32.mrb[5].mxu0  ;;  %v1183_v53 = vadd.f32 %v920_v51, %v1171_v24  ;;  %v508_v55 = vpop.f32.mrb[5].mxu1 }
 0x104   : > { %1004 = verf.f32 %v606_v46  ;;  %v1186_v54 = vadd.f32 %v1171_v24, %v444_v52  ;;  %v905_v56 = vpop.f32.mrb[6].mxu0  ;;  %v1189_v58 = vadd.f32 %v1171_v24, %v508_v55  ;;  %v921_v59 = vpop.f32.mrb[6].mxu1 }
 0x105   : > { %1006 = verf.f32 %v588_v47  ;;  %v593_v57 = vmul.f32 0.70710677, %v453_v50  ;;  %v447_v60 = vpop.f32.mrb[7].mxu0  ;;  %v609_v63 = vmul.f32 0.70710677, %v1183_v53  ;;  %v511_v0 = vpop.f32.mrb[7].mxu1  ;;  %v1196_v4 = vadd.f32 %v905_v56, %v1171_v24 }
 0x106   : > { %1008 = verf.f32 %v604_v49  ;;  %v591_v2 = vmul.f32 0.70710677, %v1186_v54  ;;  %v607_v3 = vmul.f32 0.70710677, %v1189_v58  ;;  %v1199_v5 = vadd.f32 %v921_v59, %v1171_v24 }
 0x107   : > { %1010 = verf.f32 %v593_v57  ;;  %v1202_v6 = vadd.f32 %v1171_v24, %v447_v60  ;;  %v594_v13 = vmul.f32 0.70710677, %v1196_v4  ;;  %v1206_v14 = vadd.f32 %v1171_v24, %v511_v0 }
 0x108   : > { %1012 = verf.f32 %v609_v63  ;;  %v610_v21 = vmul.f32 0.70710677, %v1199_v5  ;;  %v561_v33 = vmul.f32 0.5, %v453_v50  ;;  %v577_v55 = vmul.f32 0.5, %v1183_v53 }
 0x109   : > { %v995_v7 = vpop.eup %994  ;;  %1014 = verf.f32 %v591_v2  ;;  %v592_v27 = vmul.f32 0.70710677, %v1202_v6  ;;  %v608_v39 = vmul.f32 0.70710677, %v1206_v14  ;;  %v575_v53 = vmul.f32 0.5, %v1189_v58 }
 0x10a   : > { %v997_v11 = vpop.eup %996  ;;  %v653_v12 = vadd.f32 1.0, %v995_v7  ;;  %1016 = verf.f32 %v607_v3  ;;  %v908_v15 = vpop.f32.mrb[8].mxu0 }
 0x10b   : > { %v924_v16 = vpop.f32.mrb[8].mxu1  ;;  %v999_v17 = vpop.eup %998  ;;  %v669_v18 = vadd.f32 1.0, %v997_v11  ;;  %1018 = verf.f32 %v594_v13  ;;  %v1221_v44 = vadd.f32 %v908_v15, %v1171_v24 }
 0x10c   : > { %v460_v22 = vpop.f32.mrb[9].mxu0  ;;  %v1001_v23 = vpop.eup %1000  ;;  %v685_v25 = vmul.f32 %v653_v12, %v557_v61  ;;  %v651_v26 = vadd.f32 1.0, %v999_v17  ;;  %1020 = verf.f32 %v610_v21  ;;  %v1224_v45 = vadd.f32 %v924_v16, %v1171_v24 }
 0x10d   : > { %v524_v28 = vpop.f32.mrb[9].mxu1  ;;  %v909_v29 = vpop.f32.mrb[10].mxu0  ;;  %v701_v31 = vmul.f32 %v669_v18, %v573_v62  ;;  %v667_v32 = vadd.f32 1.0, %v1001_v23  ;;  %1022 = verf.f32 %v592_v27  ;;  %v1228_v49 = vadd.f32 %v1171_v24, %v460_v22 }
 0x10e   : > { %v1003_v30 = vpop.eup %1002  ;;  %v925_v34 = vpop.f32.mrb[10].mxu1  ;;  %717 = vst [vmem:[%s1211_s18 + $0x10] sm:$0xff] %v685_v25  ;;  %v683_v37 = vmul.f32 %v651_v26, %v555_v1  ;;  %1024 = verf.f32 %v608_v39  ;;  %v597_v56 = vmul.f32 0.70710677, %v1221_v44  ;;  %v559_v61 = vmul.f32 0.5, %v1186_v54 }
 0x10f   : > { %v463_v35 = vpop.f32.mrb[11].mxu0  ;;  %v1005_v36 = vpop.eup %1004  ;;  %v654_v38 = vadd.f32 1.0, %v1003_v30  ;;  %733 = vst [vmem:[%s1211_s18 + $0x90] sm:$0xff] %v701_v31  ;;  %v699_v42 = vmul.f32 %v667_v32, %v571_v8  ;;  %v613_v62 = vmul.f32 0.70710677, %v1224_v45  ;;  %v1246_v58 = vadd.f32 %v1171_v24, %v524_v28 }
 0x110   : > { %v1217_v40 = vpop.f32.mrb[11].mxu1  ;;  %v1007_v41 = vpop.eup %1006  ;;  %v670_v43 = vadd.f32 1.0, %v1005_v36  ;;  %715 = vst [vmem:[%s1211_s18] sm:$0xff] %v683_v37  ;;  %1026 = verf.f32 %v597_v56  ;;  %v595_v54 = vmul.f32 0.70710677, %v1228_v49  ;;  %v1249_v17 = vadd.f32 %v909_v29, %v1171_v24 }
 0x111   : > { %v1009_v46 = vpop.eup %1008  ;;  %v686_v47 = vmul.f32 %v654_v38, %v558_v9  ;;  %v652_v48 = vadd.f32 1.0, %v1007_v41  ;;  %731 = vst [vmem:[%s1211_s18 + $0x80] sm:$0xff] %v699_v42  ;;  %1028 = verf.f32 %v613_v62  ;;  %v1257_v22 = vadd.f32 %v925_v34, %v1171_v24 }
 0x112   : > { %v1011_v50 = vpop.eup %1010  ;;  %v702_v51 = vmul.f32 %v670_v43, %v574_v10  ;;  %v668_v52 = vadd.f32 1.0, %v1009_v46  ;;  %v912_v63 = vpop.f32.mrb[12].mxu0  ;;  %1030 = verf.f32 %v595_v54  ;;  %v1260_v23 = vadd.f32 %v1171_v24, %v463_v35 }
 0x113   : > { %v1013_v57 = vpop.eup %1012  ;;  %718 = vst [vmem:[%s1211_s18 + $0x18] sm:$0xff] %v686_v47  ;;  %v684_v59 = vmul.f32 %v652_v48, %v556_v19  ;;  %v657_v60 = vadd.f32 1.0, %v1011_v50  ;;  %v928_v0 = vpop.f32.mrb[12].mxu1  ;;  %v562_v27 = vmul.f32 0.5, %v1196_v4  ;;  %v611_v29 = vmul.f32 0.70710677, %v1246_v58 }
 0x114   : > { %v1015_v1 = vpop.eup %1014  ;;  %734 = vst [vmem:[%s1211_s18 + $0x98] sm:$0xff] %v702_v51  ;;  %v700_v2 = vmul.f32 %v668_v52, %v572_v20  ;;  %v673_v3 = vadd.f32 1.0, %v1013_v57  ;;  %v476_v7 = vpop.f32.mrb[13].mxu0  ;;  %v578_v31 = vmul.f32 0.5, %v1199_v5  ;;  %v598_v34 = vmul.f32 0.70710677, %v1249_v17 }
 0x115   : > { %v540_v8 = vpop.f32.mrb[13].mxu1  ;;  %v1017_v9 = vpop.eup %1016  ;;  %716 = vst [vmem:[%s1211_s18 + $0x8] sm:$0xff] %v684_v59  ;;  %v689_v10 = vmul.f32 %v657_v60, %v561_v33  ;;  %v655_v11 = vadd.f32 1.0, %v1015_v1  ;;  %v560_v33 = vmul.f32 0.5, %v1202_v6  ;;  %1032 = verf.f32 %v611_v29 }
 0x116   : > { %v1240_v12 = vpop.f32.mrb[14].mxu0  ;;  %v1242_v13 = vpop.f32.mrb[14].mxu1  ;;  %732 = vst [vmem:[%s1211_s18 + $0x88] sm:$0xff] %v700_v2  ;;  %v705_v15 = vmul.f32 %v673_v3, %v577_v55  ;;  %v671_v16 = vadd.f32 1.0, %v1017_v9  ;;  %v614_v4 = vmul.f32 0.70710677, %v1257_v22  ;;  %1034 = verf.f32 %v598_v34 }
 0x117   : > { %v1251_v18 = vpop.f32.mrb[15].mxu0  ;;  %v1253_v19 = vpop.f32.mrb[15].mxu1  ;;  %721 = vst [vmem:[%s1211_s18 + $0x30] sm:$0xff] %v689_v10  ;;  %v687_v21 = vmul.f32 %v655_v11, %v559_v61  ;;  %v576_v39 = vmul.f32 0.5, %v1206_v14  ;;  %v596_v5 = vmul.f32 0.70710677, %v1260_v23  ;;  %v1276_v42 = vadd.f32 %v1171_v24, %v1217_v40 }
 0x118   : > { %v1019_v20 = vpop.eup %1018  ;;  %737 = vst [vmem:[%s1211_s18 + $0xb0] sm:$0xff] %v705_v15  ;;  %v703_v26 = vmul.f32 %v671_v16, %v575_v53  ;;  %1036 = verf.f32 %v614_v4  ;;  %v1280_v43 = vadd.f32 %v912_v63, %v1171_v24  ;;  %v1283_v46 = vadd.f32 %v928_v0, %v1171_v24 }
 0x119   : > { %v1021_v25 = vpop.eup %1020  ;;  %v658_v28 = vadd.f32 1.0, %v1019_v20  ;;  %719 = vst [vmem:[%s1211_s18 + $0x20] sm:$0xff] %v687_v21  ;;  %1038 = verf.f32 %v596_v5  ;;  %v1286_v14 = vadd.f32 %v1171_v24, %v476_v7  ;;  %v612_v50 = vmul.f32 0.70710677, %v1276_v42 }
 0x11a   : > { %v1023_v30 = vpop.eup %1022  ;;  %v674_v32 = vadd.f32 1.0, %v1021_v25  ;;  %735 = vst [vmem:[%s1211_s18 + $0xa0] sm:$0xff] %v703_v26  ;;  %v1291_v51 = vadd.f32 %v1171_v24, %v540_v8  ;;  %v565_v52 = vmul.f32 0.5, %v1221_v44  ;;  %v601_v56 = vmul.f32 0.70710677, %v1280_v43 }
 0x11b   : > { %v690_v35 = vmul.f32 %v658_v28, %v562_v27  ;;  %v656_v36 = vadd.f32 1.0, %v1023_v30  ;;  %v1025_v37 = vpop.eup %1024  ;;  %v581_v57 = vmul.f32 0.5, %v1224_v45  ;;  %1040 = verf.f32 %v612_v50 }
 0x11c   : > { %v706_v38 = vmul.f32 %v674_v32, %v578_v31  ;;  %v672_v6 = vadd.f32 1.0, %v1025_v37  ;;  %v1027_v47 = vpop.eup %1026  ;;  %v617_v60 = vmul.f32 0.70710677, %v1283_v46  ;;  %v563_v63 = vmul.f32 0.5, %v1228_v49 }
 0x11d   : > { %722 = vst [vmem:[%s1211_s18 + $0x38] sm:$0xff] %v690_v35  ;;  %v688_v41 = vmul.f32 %v656_v36, %v560_v33  ;;  %v1029_v40 = vpop.eup %1028  ;;  %v661_v55 = vadd.f32 1.0, %v1027_v47  ;;  %1042 = verf.f32 %v601_v56  ;;  %v599_v0 = vmul.f32 0.70710677, %v1286_v14 }
 0x11e   : > { %738 = vst [vmem:[%s1211_s18 + $0xb8] sm:$0xff] %v706_v38  ;;  %v704_v48 = vmul.f32 %v672_v6, %v576_v39  ;;  %v677_v59 = vadd.f32 1.0, %v1029_v40  ;;  %v1031_v61 = vpop.eup %1030  ;;  %1044 = verf.f32 %v617_v60  ;;  %v615_v2 = vmul.f32 0.70710677, %v1291_v51 }
 0x11f   : > { %720 = vst [vmem:[%s1211_s18 + $0x28] sm:$0xff] %v688_v41  ;;  %v693_v62 = vmul.f32 %v661_v55, %v565_v52  ;;  %v659_v1 = vadd.f32 1.0, %v1031_v61  ;;  %1046 = verf.f32 %v599_v0  ;;  %v488_v45 = vadd.f32 %v1240_v12, %v1171_v24  ;;  %v1033_v53 = vpop.eup %1032 }
 0x120   : > { %736 = vst [vmem:[%s1211_s18 + $0xa8] sm:$0xff] %v704_v48  ;;  %v709_v44 = vmul.f32 %v677_v59, %v581_v57  ;;  %v1306_v3 = vadd.f32 %v1242_v13, %v1171_v24  ;;  %v1310_v49 = vadd.f32 %v1171_v24, %v1251_v18  ;;  %1048 = verf.f32 %v615_v2  ;;  %v1035_v9 = vpop.eup %1034 }
 0x121   : > { %725 = vst [vmem:[%s1211_s18 + $0x50] sm:$0xff] %v693_v62  ;;  %v691_v7 = vmul.f32 %v659_v1, %v563_v63  ;;  %v1315_v8 = vadd.f32 %v1171_v24, %v1253_v19  ;;  %v579_v10 = vmul.f32 0.5, %v1246_v58  ;;  %v675_v11 = vadd.f32 1.0, %v1033_v53 }
 0x122   : > { %741 = vst [vmem:[%s1211_s18 + $0xd0] sm:$0xff] %v709_v44  ;;  %v566_v54 = vmul.f32 0.5, %v1249_v17  ;;  %v602_v12 = vmul.f32 0.70710677, %v488_v45  ;;  %v1037_v13 = vpop.eup %1036  ;;  %v662_v15 = vadd.f32 1.0, %v1035_v9  ;;  %v582_v16 = vmul.f32 0.5, %v1257_v22 }
 0x123   : > { %723 = vst [vmem:[%s1211_s18 + $0x40] sm:$0xff] %v691_v7  ;;  %v618_v18 = vmul.f32 0.70710677, %v1306_v3  ;;  %v600_v20 = vmul.f32 0.70710677, %v1310_v49  ;;  %v1039_v24 = vpop.eup %1038  ;;  %v707_v19 = vmul.f32 %v675_v11, %v579_v10  ;;  %v678_v21 = vadd.f32 1.0, %v1037_v13 }
 0x124   : > { %v564_v58 = vmul.f32 0.5, %v1260_v23  ;;  %1050 = verf.f32 %v602_v12  ;;  %v694_v17 = vmul.f32 %v662_v15, %v566_v54  ;;  %v660_v25 = vadd.f32 1.0, %v1039_v24 }
 0x125   : > { %1052 = verf.f32 %v618_v18  ;;  %v616_v26 = vmul.f32 0.70710677, %v1315_v8  ;;  %739 = vst [vmem:[%s1211_s18 + $0xc0] sm:$0xff] %v707_v19  ;;  %v710_v22 = vmul.f32 %v678_v21, %v582_v16  ;;  %v1041_v27 = vpop.eup %1040  ;;  %v580_v30 = vmul.f32 0.5, %v1276_v42 }
 0x126   : > { %1054 = verf.f32 %v600_v20  ;;  %726 = vst [vmem:[%s1211_s18 + $0x58] sm:$0xff] %v694_v17  ;;  %v692_v28 = vmul.f32 %v660_v25, %v564_v58  ;;  %v676_v23 = vadd.f32 1.0, %v1041_v27  ;;  %v569_v32 = vmul.f32 0.5, %v1280_v43 }
 0x127   : > { %1056 = verf.f32 %v616_v26  ;;  %v1043_v29 = vpop.eup %1042  ;;  %742 = vst [vmem:[%s1211_s18 + $0xd8] sm:$0xff] %v710_v22  ;;  %v585_v36 = vmul.f32 0.5, %v1283_v46  ;;  %v567_v39 = vmul.f32 0.5, %v1286_v14  ;;  %v583_v6 = vmul.f32 0.5, %v1291_v51 }
 0x128   : > { %v1045_v31 = vpop.eup %1044  ;;  %724 = vst [vmem:[%s1211_s18 + $0x48] sm:$0xff] %v692_v28  ;;  %v665_v33 = vadd.f32 1.0, %v1043_v29  ;;  %v708_v35 = vmul.f32 %v676_v23, %v580_v30  ;;  %v570_v50 = vmul.f32 0.5, %v488_v45  ;;  %v586_v52 = vmul.f32 0.5, %v1306_v3 }
 0x129   : > { %v1047_v34 = vpop.eup %1046  ;;  %v681_v4 = vadd.f32 1.0, %v1045_v31  ;;  %v568_v57 = vmul.f32 0.5, %v1310_v49  ;;  %v584_v61 = vmul.f32 0.5, %v1315_v8 }
 0x12a   : > { %v1049_v37 = vpop.eup %1048  ;;  %v697_v38 = vmul.f32 %v665_v33, %v569_v32  ;;  %v663_v5 = vadd.f32 1.0, %v1047_v34  ;;  %740 = vst [vmem:[%s1211_s18 + $0xc8] sm:$0xff] %v708_v35 }
 0x12b   : > { %v713_v41 = vmul.f32 %v681_v4, %v585_v36  ;;  %v679_v42 = vadd.f32 1.0, %v1049_v37 }
 0x12c   : > { %729 = vst [vmem:[%s1211_s18 + $0x70] sm:$0xff] %v697_v38  ;;  %v695_v43 = vmul.f32 %v663_v5, %v567_v39 }
 0x12d   : > { %745 = vst [vmem:[%s1211_s18 + $0xf0] sm:$0xff] %v713_v41  ;;  %v711_v48 = vmul.f32 %v679_v42, %v583_v6 }
 0x12e   : > { %v1051_v47 = vpop.eup %1050  ;;  %727 = vst [vmem:[%s1211_s18 + $0x60] sm:$0xff] %v695_v43 }
 0x12f   : > { %v1053_v46 = vpop.eup %1052  ;;  %v666_v40 = vadd.f32 1.0, %v1051_v47  ;;  %743 = vst [vmem:[%s1211_s18 + $0xe0] sm:$0xff] %v711_v48 }
 0x130   : > { %v1055_v14 = vpop.eup %1054  ;;  %v682_v55 = vadd.f32 1.0, %v1053_v46 }
 0x131   : > { %v1057_v51 = vpop.eup %1056  ;;  %v698_v56 = vmul.f32 %v666_v40, %v570_v50  ;;  %v664_v59 = vadd.f32 1.0, %v1055_v14 }
 0x132   : > { %v714_v60 = vmul.f32 %v682_v55, %v586_v52  ;;  %v680_v62 = vadd.f32 1.0, %v1057_v51 }
 0x133   : > { %730 = vst [vmem:[%s1211_s18 + $0x78] sm:$0xff] %v698_v56  ;;  %v696_v63 = vmul.f32 %v664_v59, %v568_v57 }
 0x134   : > { %746 = vst [vmem:[%s1211_s18 + $0xf8] sm:$0xff] %v714_v60  ;;  %v712_v0 = vmul.f32 %v680_v62, %v584_v61 }
 0x135   : > { %728 = vst [vmem:[%s1211_s18 + $0x68] sm:$0xff] %v696_v63 }
 0x136   : > { %744 = vst [vmem:[%s1211_s18 + $0xe8] sm:$0xff] %v712_v0 }
 0x137 PF: > { %s13_s14 = sadd.s32 1, %s1080_s14   ;;  %s1359_s12 = smov %s1076_s13 }
 0x138   : > { %p10_p5 = scmp.ge.s32.totalorder %s13_s14, 4   ;;  %s1360_s13 = smov %s1362_s15 }
 0x13a   :  { %12 = sbr.rel (!%p10_p5) target bundleno = 2 (0x2), region = 62 }

</bundles_post_ra>
